<compile_context>
chip_gen: v5e
topology: v5e:2x2
jax: 0.10.0
libtpu: 0.0.40
codegen_flags: <defaults>
</compile_context>

<pallas_src>
import functools

import jax
import jax.numpy as jnp
from jax.experimental import pallas as pl
from jax.experimental.pallas import tpu as pltpu

LANE = 128      # vreg lane width (last dim)
SUBLANE = 8     # f32 sublane granularity (second-to-last dim)


def _round_up(n: int, m: int) -> int:
    return ((n + m - 1) // m) * m


def _mlp_kernel(x_ref, w1_ref, b1_ref, w2_ref, b2_ref, o_ref):
    # layer1: x @ W1^T + b1.  W1 pre-transposed to (n_in, Hp); contraction dim
    # is exact (n_in), only the hidden/output dim is lane-padded with zeros.
    x = x_ref[...].astype(w1_ref.dtype)        # no-op for f32 params; enables bf16 MXU path if opted in
    h = jnp.dot(x, w1_ref[...], preferred_element_type=jnp.float32)
    h = jnp.maximum(h + b1_ref[...].astype(jnp.float32), 0.0)   # bias + ReLU in f32 (VPU)
    # layer2: h @ W2^T + b2 -- f32 accumulation on the MXU.
    y = jnp.dot(h.astype(w2_ref.dtype), w2_ref[...], preferred_element_type=jnp.float32)
    o_ref[...] = (y + b2_ref[...].astype(jnp.float32)).astype(o_ref.dtype)


def prepare_params(w1, b1, w2, b2, param_dtype=None):
    """One-time setup: transpose nn.Linear weights to (in, out) and zero-pad
    ONLY the hidden (output-of-layer1 / input-of-layer2) dim to 128 lanes.

    w1: (H, I), b1: (H,), w2: (O, H), b2: (O,)  ->
    w1_t: (I, Hp), b1_p: (1, Hp), w2_t: (Hp, O), b2_p: (1, O)

    Zero padding is exact: padded hidden columns get zero weight and zero
    bias, so they stay 0 through the ReLU and contribute 0 to layer2.

    param_dtype: optional (e.g. jnp.bfloat16) to halve weight HBM/VMEM and hit
    the bf16 MXU path; accumulation stays f32. Default: keep input dtype.
    """
    H, I = w1.shape
    O = w2.shape[0]
    Hp = _round_up(H, LANE)
    dt = w1.dtype if param_dtype is None else param_dtype

    w1_t = jnp.zeros((I, Hp), dt).at[:, :H].set(w1.T.astype(dt))
    b1_p = jnp.zeros((1, Hp), dt).at[0, :H].set(b1.astype(dt))
    w2_t = jnp.zeros((Hp, O), dt).at[:H, :].set(w2.T.astype(dt))
    b2_p = b2.astype(dt).reshape(1, O)
    return w1_t, b1_p, w2_t, b2_p


@functools.partial(jax.jit, static_argnames=("block_b",))
def mlp_forward(x, w1_t, b1_p, w2_t, b2_p, *, block_b=1024):
    """x: (B, n_in); params from prepare_params. Returns (B, n_out)."""
    B, n_in = x.shape
    assert w1_t.shape[0] == n_in, "w1_t contraction dim must equal n_in exactly"
    Hp = w1_t.shape[1]
    n_out = w2_t.shape[1]

    # Batch tile: multiple of the f32 sublane granularity; no HBM padding of x
    # or out -- ragged batches use edge blocks via grid = cdiv(B, tb).
    tb = min(block_b, _round_up(B, SUBLANE))
    # Ensure >= 2 grid steps when possible so the "parallel" batch axis shards
    # across both v7x TensorCores (no-op on single-TC v5e/v6e).
    if B > SUBLANE and pl.cdiv(B, tb) < 2:
        tb = max(SUBLANE, _round_up(pl.cdiv(B, 2), SUBLANE))
    grid_b = pl.cdiv(B, tb)

    # VMEM budget (per TC; weights are duplicated on each TC under megacore):
    # x/out double-buffered, params at default 2-deep buffering (tiny; single-
    # buffering via pl.Buffered(1) only matters once Hp reaches a few
    # thousand), plus the f32 hidden intermediate. Cap at 48 MiB for v7x's
    # 64 MiB VMEM; the explicit limit also raises v5e's 16 MiB scoped default.
    act_bytes = jnp.dtype(x.dtype).itemsize
    par_bytes = jnp.dtype(w1_t.dtype).itemsize
    vmem_est = (
        2 * tb * n_in * act_bytes
        + 2 * tb * n_out * act_bytes
        + 2 * (n_in * Hp + Hp + Hp * n_out + n_out) * par_bytes
        + tb * Hp * 4
    )
    vmem_limit = int(min(48 * 1024 * 1024, max(32 * 1024 * 1024, 2 * vmem_est)))

    return pl.pallas_call(
        _mlp_kernel,
        out_shape=jax.ShapeDtypeStruct((B, n_out), x.dtype),
        grid=(grid_b,),
        in_specs=[
            pl.BlockSpec((tb, n_in), lambda i: (i, 0)),    # x: streamed, unpadded lanes
            pl.BlockSpec((n_in, Hp), lambda i: (0, 0)),    # W1^T: VMEM-resident
            pl.BlockSpec((1, Hp), lambda i: (0, 0)),       # b1:   VMEM-resident
            pl.BlockSpec((Hp, n_out), lambda i: (0, 0)),   # W2^T: VMEM-resident
            pl.BlockSpec((1, n_out), lambda i: (0, 0)),    # b2:   VMEM-resident
        ],
        out_specs=pl.BlockSpec((tb, n_out), lambda i: (i, 0)),  # unpadded (masked vst)
        compiler_params=pltpu.CompilerParams(
            dimension_semantics=("parallel",),  # megacore sharding on v7x
            vmem_limit_bytes=vmem_limit,
        ),
    )(x, w1_t, b1_p, w2_t, b2_p)


if __name__ == "__main__":
    # Small shapes consistent with the module (RGB -> hidden -> class logits).
    B, n_in, n_hidden, n_out = 8, 3, 32, 4

    key = jax.random.PRNGKey(0)
    kx, kw1, kb1, kw2, kb2 = jax.random.split(key, 5)

    x = jax.random.normal(kx, (B, n_in), dtype=jnp.float32)
    # nn.Linear-shaped parameters: (out_features, in_features).
    w1 = jax.random.normal(kw1, (n_hidden, n_in), dtype=jnp.float32) * 0.1
    b1 = jax.random.normal(kb1, (n_hidden,), dtype=jnp.float32) * 0.1
    w2 = jax.random.normal(kw2, (n_out, n_hidden), dtype=jnp.float32) * 0.1
    b2 = jax.random.normal(kb2, (n_out,), dtype=jnp.float32) * 0.1

    # One-time parameter prep (transpose + hidden-dim lane padding), then forward.
    params = prepare_params(w1, b1, w2, b2)
    out = mlp_forward(x, *params)
    out = jax.block_until_ready(out)

    # Pure-JAX reference (same semantics as the torch module).
    ref = jnp.maximum(x @ w1.T + b1, 0.0) @ w2.T + b2
    assert out.shape == (B, n_out)
    assert jnp.allclose(out, ref, atol=1e-5, rtol=1e-5), "mismatch vs reference"

    # Also exercise a ragged / multi-step-grid batch to cover edge blocks.
    B2 = 300
    x2 = jax.random.normal(kx, (B2, n_in), dtype=jnp.float32)
    out2 = jax.block_until_ready(mlp_forward(x2, *params))
    ref2 = jnp.maximum(x2 @ w1.T + b1, 0.0) @ w2.T + b2
    assert out2.shape == (B2, n_out)
    assert jnp.allclose(out2, ref2, atol=1e-5, rtol=1e-5), "mismatch vs reference (ragged)"

    print("KERNEL_OK")
</pallas_src>

<mosaic_0001>
module attributes {stable_mosaic.version = 11 : i64} {
  func.func @_mlp_kernel(%arg0: i32, %arg1: memref<8x3xf32, #tpu.memory_space<vmem>>, %arg2: memref<3x128xf32, #tpu.memory_space<vmem>>, %arg3: memref<1x128xf32, #tpu.memory_space<vmem>>, %arg4: memref<128x4xf32, #tpu.memory_space<vmem>>, %arg5: memref<1x4xf32, #tpu.memory_space<vmem>>, %arg6: memref<8x4xf32, #tpu.memory_space<vmem>>) attributes {dimension_semantics = [#tpu.dimension_semantics<parallel>], iteration_bounds = array<i64: 1>, scalar_prefetch = 0 : i64, scratch_operands = 0 : i64, tpu.core_type = #tpu.core_type<tc>, window_params = [{transform_indices = @transform_0, window_bounds = array<i64: 8, 3>}, {pipeline_mode = #tpu.pipeline_mode<synchronous>, transform_indices = @transform_1, window_bounds = array<i64: 3, 128>}, {pipeline_mode = #tpu.pipeline_mode<synchronous>, transform_indices = @transform_2, window_bounds = array<i64: 1, 128>}, {pipeline_mode = #tpu.pipeline_mode<synchronous>, transform_indices = @transform_3, window_bounds = array<i64: 128, 4>}, {pipeline_mode = #tpu.pipeline_mode<synchronous>, transform_indices = @transform_4, window_bounds = array<i64: 1, 4>}, {transform_indices = @transform_5, window_bounds = array<i64: 8, 4>}]} {
    %c0 = arith.constant 0 : index
    %c0_0 = arith.constant 0 : index
    %0 = vector.load %arg1[%c0, %c0_0] : memref<8x3xf32, #tpu.memory_space<vmem>>, vector<8x3xf32>
    %c0_1 = arith.constant 0 : index
    %c0_2 = arith.constant 0 : index
    %1 = vector.load %arg2[%c0_1, %c0_2] : memref<3x128xf32, #tpu.memory_space<vmem>>, vector<3x128xf32>
    %cst = arith.constant dense<0.000000e+00> : vector<8x128xf32>
    %2 = tpu.matmul %0, %1, %cst {dimension_numbers = #tpu.dot_dimension_numbers<[1], [0], [0], [1], [0, 0, 1, 1], [], []>} : vector<8x3xf32>, vector<3x128xf32>, vector<8x128xf32> -> vector<8x128xf32>
    %c0_3 = arith.constant 0 : index
    %c0_4 = arith.constant 0 : index
    %3 = vector.load %arg3[%c0_3, %c0_4] : memref<1x128xf32, #tpu.memory_space<vmem>>, vector<1x128xf32>
    %4 = vector.broadcast %3 : vector<1x128xf32> to vector<8x128xf32>
    %5 = arith.addf %2, %4 : vector<8x128xf32>
    %cst_5 = arith.constant 0.000000e+00 : f32
    %6 = vector.broadcast %cst_5 : f32 to vector<8x128xf32>
    %7 = arith.maximumf %5, %6 : vector<8x128xf32>
    %c0_6 = arith.constant 0 : index
    %c0_7 = arith.constant 0 : index
    %8 = vector.load %arg4[%c0_6, %c0_7] : memref<128x4xf32, #tpu.memory_space<vmem>>, vector<128x4xf32>
    %cst_8 = arith.constant dense<0.000000e+00> : vector<8x4xf32>
    %9 = tpu.matmul %7, %8, %cst_8 {dimension_numbers = #tpu.dot_dimension_numbers<[1], [0], [0], [1], [0, 0, 1, 1], [], []>} : vector<8x128xf32>, vector<128x4xf32>, vector<8x4xf32> -> vector<8x4xf32>
    %c0_9 = arith.constant 0 : index
    %c0_10 = arith.constant 0 : index
    %10 = vector.load %arg5[%c0_9, %c0_10] : memref<1x4xf32, #tpu.memory_space<vmem>>, vector<1x4xf32>
    %11 = vector.broadcast %10 : vector<1x4xf32> to vector<8x4xf32>
    %12 = arith.addf %9, %11 : vector<8x4xf32>
    %c0_11 = arith.constant 0 : index
    %c0_12 = arith.constant 0 : index
    %13 = vector.load %arg6[%c0_11, %c0_12] : memref<8x4xf32, #tpu.memory_space<vmem>>, vector<8x4xf32>
    tpu.vector_store %arg6[%c0_11, %c0_12], %12 {strides = array<i32>} : memref<8x4xf32, #tpu.memory_space<vmem>>, vector<8x4xf32>,
    return
  }
  func.func @transform_0(%arg0: i32) -> (i32, i32) {
    %c0_i32 = arith.constant 0 : i32
    %c0_i32_0 = arith.constant 0 : i32
    return %arg0, %c0_i32 : i32, i32
  }
  func.func @transform_1(%arg0: i32) -> (i32, i32) {
    %c0_i32 = arith.constant 0 : i32
    %c0_i32_0 = arith.constant 0 : i32
    %c0_i32_1 = arith.constant 0 : i32
    return %c0_i32, %c0_i32_0 : i32, i32
  }
  func.func @transform_2(%arg0: i32) -> (i32, i32) {
    %c0_i32 = arith.constant 0 : i32
    %c0_i32_0 = arith.constant 0 : i32
    %c0_i32_1 = arith.constant 0 : i32
    return %c0_i32, %c0_i32_0 : i32, i32
  }
  func.func @transform_3(%arg0: i32) -> (i32, i32) {
    %c0_i32 = arith.constant 0 : i32
    %c0_i32_0 = arith.constant 0 : i32
    %c0_i32_1 = arith.constant 0 : i32
    return %c0_i32, %c0_i32_0 : i32, i32
  }
  func.func @transform_4(%arg0: i32) -> (i32, i32) {
    %c0_i32 = arith.constant 0 : i32
    %c0_i32_0 = arith.constant 0 : i32
    %c0_i32_1 = arith.constant 0 : i32
    return %c0_i32, %c0_i32_0 : i32, i32
  }
  func.func @transform_5(%arg0: i32) -> (i32, i32) {
    %c0_i32 = arith.constant 0 : i32
    %c0_i32_0 = arith.constant 0 : i32
    return %arg0, %c0_i32 : i32, i32
  }
}

</mosaic_0001>

<bundles_post_ra>
// kernel: mlp_forward.1
= control target key start
LH: loop header
LB: loop body
LE: loop exit
PB: predicated region body
PF: predicated region fallthrough
CT: control target
= control target key end

     0   :  { %vm30_vm0 = vcmask 1042432   ;;  %vm26_vm1 = vcmask 23552   ;;  %vm95_vm2 = vcmask 31744   ;;  %s198_s1 = inlined_call_operand.vmem [shape: f32[3,128], index: 1, kind: input, shape index: {}]   ;;  %s199_s0 = inlined_call_operand.vmem [shape: f32[8,3], index: 0, kind: input, shape index: {}]   ;;  %s200_s3 = inlined_call_operand.vmem [shape: f32[128,4], index: 3, kind: input, shape index: {}]   ;;  %s201_s2 = inlined_call_operand.vmem [shape: f32[1,128], index: 2, kind: input, shape index: {}]   ;;  %s202_s4 = inlined_call_operand.vmem [shape: f32[1,4], index: 4, kind: input, shape index: {}]   ;;  %s203_s5 = inlined_call_operand.vmem [shape: f32[8,4], index: 5, kind: output, shape index: {}]  }
   0x1   :  { %v21_v0 = vld [vmem:[%s198_s1] sm:$0x7]  ;;  %v70_v2 = vld [vmem:[%s200_s3 + $0x78] sm:$0xff]  ;;  %v69_v3 = vld [vmem:[%s200_s3 + $0x70] sm:$0xff] }
   0x2   :  { %v20_v1 = vld [vmem:[%s199_s0] sm:$0xff]  ;;  %101 = vmatpush.msk.msra.mxu0 %vm30_vm0, %v21_v0  ;;  %75 = vmatpush.msra.mxu1 %v70_v2  ;;  %v68_v4 = vld [vmem:[%s200_s3 + $0x68] sm:$0xff]  ;;  %v66_v6 = vld [vmem:[%s200_s3 + $0x58] sm:$0xff] }
   0x3   :  { %102 = vmatmul.msk.f32.vlgmr.msra.gmra.mxu0 %vm26_vm1, %v20_v1  ;;  %v67_v5 = vld [vmem:[%s200_s3 + $0x60] sm:$0xff]  ;;  %v65_v7 = vld [vmem:[%s200_s3 + $0x50] sm:$0xff]  ;;  %v64_v8 = vld [vmem:[%s200_s3 + $0x48] sm:$0xff] }
   0x4   :  { %76 = vmatpush.msra.mxu1 %v69_v3  ;;  %v63_v9 = vld [vmem:[%s200_s3 + $0x40] sm:$0xff]  ;;  %v62_v10 = vld [vmem:[%s200_s3 + $0x38] sm:$0xff]  ;;  %v61_v11 = vld [vmem:[%s200_s3 + $0x30] sm:$0xff] }
   0x5   :  { %v60_v12 = vld [vmem:[%s200_s3 + $0x28] sm:$0xff]  ;;  %v59_v13 = vld [vmem:[%s200_s3 + $0x20] sm:$0xff]  ;;  %v58_v14 = vld [vmem:[%s200_s3 + $0x18] sm:$0xff] }
   0x6   :  { %77 = vmatpush.msra.mxu1 %v68_v4  ;;  %v57_v15 = vld [vmem:[%s200_s3 + $0x10] sm:$0xff]  ;;  %v56_v16 = vld [vmem:[%s200_s3 + $0x8] sm:$0xff]  ;;  %v55_v17 = vld [vmem:[%s200_s3] sm:$0xff] }
   0x7   :  { %v103_v18 = vld [vmem:[%s201_s2] ss:$0 sm:$0xff] }
   0x8   :  { %78 = vmatpush.msra.mxu1 %v67_v5  ;;  %v104_v22 = vld [vmem:[%s202_s4] ss:$0 sm:$0xff] }
   0xa   :  { %79 = vmatpush.msra.mxu1 %v66_v6 }
   0xc   :  { %80 = vmatpush.msra.mxu1 %v65_v7 }
   0xe   :  { %81 = vmatpush.msra.mxu1 %v64_v8 }
  0x10   :  { %82 = vmatpush.msra.mxu1 %v63_v9 }
  0x12   :  { %83 = vmatpush.msra.mxu1 %v62_v10 }
  0x14   :  { %84 = vmatpush.msra.mxu1 %v61_v11 }
  0x16   :  { %85 = vmatpush.msra.mxu1 %v60_v12 }
  0x18   :  { %86 = vmatpush.msra.mxu1 %v59_v13 }
  0x1a   :  { %87 = vmatpush.msra.mxu1 %v58_v14 }
  0x1c   :  { %88 = vmatpush.msra.mxu1 %v57_v15 }
  0x1e   :  { %89 = vmatpush.msra.mxu1 %v56_v16 }
  0x20   :  { %90 = vmatpush.msra.mxu1 %v55_v17 }
  0x80   :  { %v51_v19 = vpop.f32.mrf.mxu0 }
  0x81   :  { %v52_v20 = vadd.f32 %v103_v18, %v51_v19 }
  0x83   :  { %v54_v21 = vmax.f32 %v52_v20, 0.0 }
  0x85   :  { %91 = vmatmul.f32.vlgmr.msra.gmra.mxu1 %v54_v21 }
 0x102   :  { %v92_v23 = vpop.f32.mrf.mxu1 }
 0x103   :  { %v93_v24 = vadd.f32 %v104_v22, %v92_v23 }
 0x105   :  { %96 = vst.msk [vmem:[%s203_s5] sm:$0xff] %vm95_vm2, %v93_v24 }

</bundles_post_ra>
